<compile_context>
chip_gen: v5e
topology: v5e:2x2
jax: 0.10.0
libtpu: 0.0.40
codegen_flags: <defaults>
</compile_context>

<pallas_src>
import math
import functools

import jax
import jax.numpy as jnp
from jax.experimental import pallas as pl
from jax.experimental.pallas import tpu as pltpu


def _pick_tile(n: int, target: int) -> int:
    """Largest tile <= target that divides n (falls back to the full dim)."""
    t = min(target, n)
    while t > 8 and n % t:
        t //= 2
    return t if n % t == 0 else n


def _round_up(n: int, m: int) -> int:
    return ((n + m - 1) // m) * m


def _compiler_params(semantics, vmem_bytes_needed):
    """Only raise the scoped-VMEM limit when the residency plan needs it;
    cap well under v7x's 64 MiB physical VMEM."""
    if vmem_bytes_needed <= 12 * 1024 * 1024:
        return pltpu.CompilerParams(dimension_semantics=semantics)
    limit = int(min(max(2 * vmem_bytes_needed, 32 * 1024 * 1024),
                    56 * 1024 * 1024))
    return pltpu.CompilerParams(dimension_semantics=semantics,
                                vmem_limit_bytes=limit)


# --------------------------------------------------------------------------
# Kernel 1: fused QKV projection.
#   x block:      (ts, D)
#   weight:       (D, 3*H*d_pad)   resident (constant index_map)
#   bias:         (1, 3*H*d_pad)   resident
#   outputs:      q/k/v blocks (ts, H*d_pad) written to (B, S, H*d_pad)
# --------------------------------------------------------------------------
def _qkv_proj_kernel(x_ref, w_ref, b_ref, q_ref, k_ref, v_ref, *, dp_total):
    x = x_ref[...]
    y = jnp.dot(x, w_ref[...], preferred_element_type=jnp.float32) + b_ref[...]
    y = y.astype(q_ref.dtype)
    # Slices at multiples of 128 lanes -> aligned, lane-dense stores.
    q_ref[...] = y[:, :dp_total]
    k_ref[...] = y[:, dp_total:2 * dp_total]
    v_ref[...] = y[:, 2 * dp_total:]


# --------------------------------------------------------------------------
# Kernel 2: flash-attention core with online softmax.
#   grid = (B, H, n_q_tiles, n_kv_tiles); kv axis is the reduction axis.
# --------------------------------------------------------------------------
def _flash_attn_kernel(q_ref, k_ref, v_ref, o_ref, m_sc, l_sc, acc_sc, *,
                       tq: int, tk: int, causal: bool):
    qi = pl.program_id(2)
    ki = pl.program_id(3)

    @pl.when(ki == 0)
    def _init():
        m_sc[...] = jnp.full(m_sc.shape, -jnp.inf, dtype=m_sc.dtype)
        l_sc[...] = jnp.zeros_like(l_sc)
        acc_sc[...] = jnp.zeros_like(acc_sc)

    def _update(masked):
        q = q_ref[...]            # (tq, d_pad), already scaled by 1/sqrt(d_head)
        k = k_ref[...]            # (tk, d_pad)
        v = v_ref[...]            # (tk, d_pad)
        # scores = q @ k^T without materializing a transposed copy of k.
        s = jax.lax.dot_general(q, k, (((1,), (1,)), ((), ())),
                                preferred_element_type=jnp.float32)   # (tq, tk)
        if masked:
            row = qi * tq + jax.lax.broadcasted_iota(jnp.int32, (tq, tk), 0)
            col = ki * tk + jax.lax.broadcasted_iota(jnp.int32, (tq, tk), 1)
            s = jnp.where(col > row, -jnp.inf, s)

        m_prev = m_sc[...]
        m_new = jnp.maximum(m_prev, jnp.max(s, axis=-1, keepdims=True))
        alpha = jnp.exp(m_prev - m_new)
        p = jnp.exp(s - m_new)
        l_sc[...] = alpha * l_sc[...] + jnp.sum(p, axis=-1, keepdims=True)
        acc_sc[...] = alpha * acc_sc[...] + jnp.dot(
            p.astype(v.dtype), v, preferred_element_type=jnp.float32)
        m_sc[...] = m_new

    if causal:
        # kv tile 0 is never skipped, so every row's max is finite.
        needed = ki * tk <= (qi + 1) * tq - 1
        fully_visible = (ki + 1) * tk - 1 <= qi * tq

        @pl.when(needed & fully_visible)
        def _():                     # interior tile: no mask VPU work
            _update(masked=False)

        @pl.when(needed & jnp.logical_not(fully_visible))
        def _():                     # diagonal-straddling tile: mask needed
            _update(masked=True)
    else:
        _update(masked=False)

    @pl.when(ki == pl.num_programs(3) - 1)
    def _finalize():
        # Exact reciprocal: negligible extra cost, removes ~1e-3 softmax
        # normalization error of the approx path.
        o_ref[...] = (acc_sc[...] / l_sc[...]).astype(o_ref.dtype)


# --------------------------------------------------------------------------
# Kernel 3: output projection, head reduction collapsed into one matmul.
#   y[b, s_tile] = attn[b, s_tile, :] @ W_out_padded + b_out
# --------------------------------------------------------------------------
def _out_proj_kernel(attn_ref, w_ref, b_ref, y_ref):
    y_ref[...] = (jnp.dot(attn_ref[...], w_ref[...],
                          preferred_element_type=jnp.float32)
                  + b_ref[...]).astype(y_ref.dtype)


# --------------------------------------------------------------------------
# Wrapper
# --------------------------------------------------------------------------
def self_attention(x, w_in, b_in, w_out, b_out, *, n_heads: int,
                   causal_mask: bool = False,
                   q_tile: int = 512, kv_tile: int = 256, seq_tile: int = 512):
    """x: (B, S, D); w_in: (D, 3D) (transposed nn.Linear weight); b_in: (3D,);
    w_out: (D, D) (transposed); b_out: (D,)."""
    B, S, D = x.shape
    H = n_heads
    d_head = D // H
    assert d_head * H == D
    dtype = x.dtype
    itemsize = jnp.dtype(dtype).itemsize

    # Pad head dim to a multiple of 128 so all q/k/v blocks are lane-dense.
    d_pad = _round_up(d_head, 128)
    Dp = H * d_pad

    tq = _pick_tile(S, q_tile)
    tk = _pick_tile(S, kv_tile)
    ts = _pick_tile(S, seq_tile)
    n_q, n_k, n_s = S // tq, S // tk, S // ts

    # ---- weight preprocessing (plain JAX, one-time, outside the kernels) ----
    wq, wk, wv = jnp.split(w_in, 3, axis=1)   # each (D, D)
    bq, bk, bv = jnp.split(b_in, 3)           # each (D,)

    # Fold the 1/sqrt(d_head) softmax scale into the query projection.
    inv_scale = 1.0 / math.sqrt(d_head)
    wq = wq * inv_scale
    bq = bq * inv_scale

    def _pad_w(w):   # (D, D) -> (D, H*d_pad): zero-padded per-head columns
        w = w.reshape(D, H, d_head)
        w = jnp.pad(w, ((0, 0), (0, 0), (0, d_pad - d_head)))
        return w.reshape(D, Dp)

    def _pad_b(b):   # (D,) -> (H*d_pad,)
        b = b.reshape(H, d_head)
        b = jnp.pad(b, ((0, 0), (0, d_pad - d_head)))
        return b.reshape(Dp)

    # Fused [Q | K | V] weight/bias, single resident operand for kernel 1.
    w_qkv = jnp.concatenate([_pad_w(wq), _pad_w(wk), _pad_w(wv)],
                            axis=1).astype(dtype)                    # (D, 3*Dp)
    b_qkv = jnp.concatenate([_pad_b(bq), _pad_b(bk), _pad_b(bv)]
                            ).reshape(1, 3 * Dp).astype(dtype)

    # Padded output-projection weight: zero rows for padded head lanes.
    w_out_p = jnp.pad(w_out.reshape(H, d_head, D),
                      ((0, 0), (0, d_pad - d_head), (0, 0))
                      ).reshape(Dp, D).astype(dtype)                 # (Dp, D)
    b_out_2d = b_out.reshape(1, D).astype(dtype)

    # ------------------------- 1) QKV projection ----------------------------
    qkv_shape = jax.ShapeDtypeStruct((B, S, Dp), dtype)
    qkv_vmem = ((D * 3 * Dp + 3 * Dp) * itemsize            # resident weights
                + 2 * (ts * D + 3 * ts * Dp) * itemsize)    # double-buffered tiles
    qkv_cost = pl.CostEstimate(
        flops=2 * B * S * D * 3 * Dp,
        transcendentals=0,
        bytes_accessed=(B * S * D + D * 3 * Dp + 3 * Dp
                        + 3 * B * S * Dp) * itemsize)

    q, k, v = pl.pallas_call(
        functools.partial(_qkv_proj_kernel, dp_total=Dp),
        out_shape=(qkv_shape, qkv_shape, qkv_shape),
        grid_spec=pltpu.PrefetchScalarGridSpec(
            num_scalar_prefetch=0,
            grid=(B, n_s),
            in_specs=[
                pl.BlockSpec((None, ts, D), lambda b, s: (b, s, 0)),     # x
                pl.BlockSpec((D, 3 * Dp), lambda b, s: (0, 0)),          # w (resident)
                pl.BlockSpec((1, 3 * Dp), lambda b, s: (0, 0)),          # b (resident)
            ],
            out_specs=(
                pl.BlockSpec((None, ts, Dp), lambda b, s: (b, s, 0)),    # q
                pl.BlockSpec((None, ts, Dp), lambda b, s: (b, s, 0)),    # k
                pl.BlockSpec((None, ts, Dp), lambda b, s: (b, s, 0)),    # v
            ),
        ),
        compiler_params=_compiler_params(("parallel", "parallel"), qkv_vmem),
        cost_estimate=qkv_cost,
    )(x, w_qkv, b_qkv)

    # ------------------------- 2) Flash attention ---------------------------
    def q_map(b, h, i, j):
        return (b, i, h)

    if causal_mask:
        def kv_map(b, h, i, j):
            # Clamp to the last kv tile this q tile needs: skipped (future)
            # iterations repeat the previous block index -> Pallas dedups the
            # DMA, so no HBM traffic is spent on fully-masked tiles.
            last = ((i + 1) * tq - 1) // tk
            return (b, jnp.minimum(j, last), h)
    else:
        def kv_map(b, h, i, j):
            return (b, j, h)

    flash_vmem = (2 * (tq * d_pad + 2 * tk * d_pad) * itemsize   # in tiles (2-buf)
                  + 2 * tq * d_pad * itemsize                    # out tile (2-buf)
                  + (tq * d_pad + 2 * tq) * 4)                   # f32 scratch
    flash_cost = pl.CostEstimate(
        flops=4 * B * H * S * S * d_pad,
        transcendentals=B * H * S * S,
        bytes_accessed=4 * B * S * Dp * itemsize)

    attn = pl.pallas_call(
        functools.partial(_flash_attn_kernel, tq=tq, tk=tk, causal=causal_mask),
        out_shape=jax.ShapeDtypeStruct((B, S, Dp), dtype),
        grid_spec=pltpu.PrefetchScalarGridSpec(
            num_scalar_prefetch=0,
            grid=(B, H, n_q, n_k),
            in_specs=[
                pl.BlockSpec((None, tq, d_pad), q_map),                  # q
                pl.BlockSpec((None, tk, d_pad), kv_map),                 # k
                pl.BlockSpec((None, tk, d_pad), kv_map),                 # v
            ],
            out_specs=pl.BlockSpec((None, tq, d_pad), q_map),
            scratch_shapes=[
                pltpu.VMEM((tq, 1), jnp.float32),        # running max m
                pltpu.VMEM((tq, 1), jnp.float32),        # running sum l
                pltpu.VMEM((tq, d_pad), jnp.float32),    # output accumulator
            ],
        ),
        compiler_params=_compiler_params(
            ("parallel", "parallel", "parallel", "arbitrary"), flash_vmem),
        cost_estimate=flash_cost,
    )(q, k, v)

    # ------------------------- 3) Output projection -------------------------
    out_vmem = ((Dp * D + D) * itemsize                       # resident weights
                + 2 * (ts * Dp + ts * D) * itemsize)          # tiles (2-buf)
    out_cost = pl.CostEstimate(
        flops=2 * B * S * Dp * D,
        transcendentals=0,
        bytes_accessed=(B * S * Dp + Dp * D + D + B * S * D) * itemsize)

    y = pl.pallas_call(
        _out_proj_kernel,
        out_shape=jax.ShapeDtypeStruct((B, S, D), dtype),
        grid_spec=pltpu.PrefetchScalarGridSpec(
            num_scalar_prefetch=0,
            grid=(B, n_s),
            in_specs=[
                pl.BlockSpec((None, ts, Dp), lambda b, s: (b, s, 0)),    # attn
                pl.BlockSpec((Dp, D), lambda b, s: (0, 0)),              # w_out (resident)
                pl.BlockSpec((1, D), lambda b, s: (0, 0)),               # b_out (resident)
            ],
            out_specs=pl.BlockSpec((None, ts, D), lambda b, s: (b, s, 0)),
        ),
        compiler_params=_compiler_params(("parallel", "parallel"), out_vmem),
        cost_estimate=out_cost,
    )(attn, w_out_p, b_out_2d)

    return y


# --------------------------------------------------------------------------
# Pure-JAX reference matching the PyTorch forward exactly.
# --------------------------------------------------------------------------
def self_attention_ref(x, w_in, b_in, w_out, b_out, *, n_heads: int,
                       causal_mask: bool = False):
    B, S, D = x.shape
    d_head = D // n_heads
    qkv = x @ w_in + b_in
    q, k, v = jnp.split(qkv, 3, axis=-1)

    def heads(t):
        return t.reshape(B, S, n_heads, d_head).transpose(0, 2, 1, 3)

    q, k, v = heads(q), heads(k), heads(v)
    w = jnp.einsum('bhqd,bhkd->bhqk', q, k)
    if causal_mask:
        mask = jnp.triu(jnp.ones((S, S), dtype=bool), k=1)
        w = jnp.where(mask, -jnp.inf, w)
    w = w / math.sqrt(d_head)
    w = jax.nn.softmax(w, axis=-1)
    out = jnp.einsum('bhqk,bhkd->bhqd', w, v)
    out = out.transpose(0, 2, 1, 3).reshape(B, S, D)
    return out @ w_out + b_out


if __name__ == "__main__":
    B, S, D = 2, 8, 32
    n_heads = 4

    key = jax.random.PRNGKey(0)
    k_x, k_wi, k_bi, k_wo, k_bo = jax.random.split(key, 5)

    x = jax.random.normal(k_x, (B, S, D), dtype=jnp.float32)
    # nn.Linear(d_embed, 3*d_embed): weight (3D, D) -> passed transposed (D, 3D)
    w_in = jax.random.normal(k_wi, (D, 3 * D), dtype=jnp.float32) * 0.05
    b_in = jax.random.normal(k_bi, (3 * D,), dtype=jnp.float32) * 0.05
    # nn.Linear(d_embed, d_embed): weight (D, D) -> passed transposed (D, D)
    w_out = jax.random.normal(k_wo, (D, D), dtype=jnp.float32) * 0.05
    b_out = jax.random.normal(k_bo, (D,), dtype=jnp.float32) * 0.05

    for causal in (True, False):
        out = self_attention(x, w_in, b_in, w_out, b_out,
                             n_heads=n_heads, causal_mask=causal)
        out = jax.block_until_ready(out)
        ref = self_attention_ref(x, w_in, b_in, w_out, b_out,
                                 n_heads=n_heads, causal_mask=causal)
        assert jnp.allclose(out, ref, atol=2e-3, rtol=2e-3), \
            f"mismatch vs reference (causal={causal})"

    print("KERNEL_OK")
</pallas_src>

<mosaic_0001>
module attributes {stable_mosaic.version = 11 : i64} {
  func.func @_qkv_proj_kernel(%arg0: i32, %arg1: i32, %arg2: memref<1x8x32xf32, #tpu.memory_space<vmem>>, %arg3: memref<32x1536xf32, #tpu.memory_space<vmem>>, %arg4: memref<1x1536xf32, #tpu.memory_space<vmem>>, %arg5: memref<1x8x512xf32, #tpu.memory_space<vmem>>, %arg6: memref<1x8x512xf32, #tpu.memory_space<vmem>>, %arg7: memref<1x8x512xf32, #tpu.memory_space<vmem>>) attributes {dimension_semantics = [#tpu.dimension_semantics<parallel>, #tpu.dimension_semantics<parallel>], iteration_bounds = array<i64: 2, 1>, scalar_prefetch = 0 : i64, scratch_operands = 0 : i64, tpu.core_type = #tpu.core_type<tc>, window_params = [{transform_indices = @transform_0, window_bounds = array<i64: 1, 8, 32>}, {pipeline_mode = #tpu.pipeline_mode<synchronous>, transform_indices = @transform_1, window_bounds = array<i64: 32, 1536>}, {pipeline_mode = #tpu.pipeline_mode<synchronous>, transform_indices = @transform_2, window_bounds = array<i64: 1, 1536>}, {transform_indices = @transform_3, window_bounds = array<i64: 1, 8, 512>}, {transform_indices = @transform_4, window_bounds = array<i64: 1, 8, 512>}, {transform_indices = @transform_5, window_bounds = array<i64: 1, 8, 512>}]} {
    %c0 = arith.constant 0 : index
    %c0_0 = arith.constant 0 : index
    %c0_1 = arith.constant 0 : index
    %0 = vector.load %arg2[%c0, %c0_0, %c0_1] : memref<1x8x32xf32, #tpu.memory_space<vmem>>, vector<1x8x32xf32>
    %1 = vector.shape_cast %0 : vector<1x8x32xf32> to vector<8x32xf32>
    %c0_2 = arith.constant 0 : index
    %c0_3 = arith.constant 0 : index
    %2 = vector.load %arg3[%c0_2, %c0_3] : memref<32x1536xf32, #tpu.memory_space<vmem>>, vector<32x1536xf32>
    %cst = arith.constant dense<0.000000e+00> : vector<8x1536xf32>
    %3 = tpu.matmul %1, %2, %cst {dimension_numbers = #tpu.dot_dimension_numbers<[1], [0], [0], [1], [0, 0, 1, 1], [], []>} : vector<8x32xf32>, vector<32x1536xf32>, vector<8x1536xf32> -> vector<8x1536xf32>
    %c0_4 = arith.constant 0 : index
    %c0_5 = arith.constant 0 : index
    %4 = vector.load %arg4[%c0_4, %c0_5] : memref<1x1536xf32, #tpu.memory_space<vmem>>, vector<1x1536xf32>
    %5 = vector.broadcast %4 : vector<1x1536xf32> to vector<8x1536xf32>
    %6 = arith.addf %3, %5 : vector<8x1536xf32>
    %7 = vector.extract_strided_slice %6 {offsets = [0, 0], sizes = [8, 512], strides = [1, 1]} : vector<8x1536xf32> to vector<8x512xf32>
    %c0_6 = arith.constant 0 : index
    %c0_7 = arith.constant 0 : index
    %c0_8 = arith.constant 0 : index
    %8 = vector.load %arg5[%c0_6, %c0_7, %c0_8] : memref<1x8x512xf32, #tpu.memory_space<vmem>>, vector<1x8x512xf32>
    %9 = vector.shape_cast %8 : vector<1x8x512xf32> to vector<8x512xf32>
    %10 = vector.shape_cast %7 : vector<8x512xf32> to vector<1x8x512xf32>
    tpu.vector_store %arg5[%c0_6, %c0_7, %c0_8], %10 {strides = array<i32>} : memref<1x8x512xf32, #tpu.memory_space<vmem>>, vector<1x8x512xf32>,
    %11 = vector.extract_strided_slice %6 {offsets = [0, 512], sizes = [8, 512], strides = [1, 1]} : vector<8x1536xf32> to vector<8x512xf32>
    %c0_9 = arith.constant 0 : index
    %c0_10 = arith.constant 0 : index
    %c0_11 = arith.constant 0 : index
    %12 = vector.load %arg6[%c0_9, %c0_10, %c0_11] : memref<1x8x512xf32, #tpu.memory_space<vmem>>, vector<1x8x512xf32>
    %13 = vector.shape_cast %12 : vector<1x8x512xf32> to vector<8x512xf32>
    %14 = vector.shape_cast %11 : vector<8x512xf32> to vector<1x8x512xf32>
    tpu.vector_store %arg6[%c0_9, %c0_10, %c0_11], %14 {strides = array<i32>} : memref<1x8x512xf32, #tpu.memory_space<vmem>>, vector<1x8x512xf32>,
    %15 = vector.extract_strided_slice %6 {offsets = [0, 1024], sizes = [8, 512], strides = [1, 1]} : vector<8x1536xf32> to vector<8x512xf32>
    %c0_12 = arith.constant 0 : index
    %c0_13 = arith.constant 0 : index
    %c0_14 = arith.constant 0 : index
    %16 = vector.load %arg7[%c0_12, %c0_13, %c0_14] : memref<1x8x512xf32, #tpu.memory_space<vmem>>, vector<1x8x512xf32>
    %17 = vector.shape_cast %16 : vector<1x8x512xf32> to vector<8x512xf32>
    %18 = vector.shape_cast %15 : vector<8x512xf32> to vector<1x8x512xf32>
    tpu.vector_store %arg7[%c0_12, %c0_13, %c0_14], %18 {strides = array<i32>} : memref<1x8x512xf32, #tpu.memory_space<vmem>>, vector<1x8x512xf32>,
    return
  }
  func.func @transform_0(%arg0: i32, %arg1: i32) -> (i32, i32, i32) {
    %c0_i32 = arith.constant 0 : i32
    %c0_i32_0 = arith.constant 0 : i32
    return %arg0, %arg1, %c0_i32 : i32, i32, i32
  }
  func.func @transform_1(%arg0: i32, %arg1: i32) -> (i32, i32) {
    %c0_i32 = arith.constant 0 : i32
    %c0_i32_0 = arith.constant 0 : i32
    %c0_i32_1 = arith.constant 0 : i32
    return %c0_i32, %c0_i32_0 : i32, i32
  }
  func.func @transform_2(%arg0: i32, %arg1: i32) -> (i32, i32) {
    %c0_i32 = arith.constant 0 : i32
    %c0_i32_0 = arith.constant 0 : i32
    %c0_i32_1 = arith.constant 0 : i32
    return %c0_i32, %c0_i32_0 : i32, i32
  }
  func.func @transform_3(%arg0: i32, %arg1: i32) -> (i32, i32, i32) {
    %c0_i32 = arith.constant 0 : i32
    %c0_i32_0 = arith.constant 0 : i32
    return %arg0, %arg1, %c0_i32 : i32, i32, i32
  }
  func.func @transform_4(%arg0: i32, %arg1: i32) -> (i32, i32, i32) {
    %c0_i32 = arith.constant 0 : i32
    %c0_i32_0 = arith.constant 0 : i32
    return %arg0, %arg1, %c0_i32 : i32, i32, i32
  }
  func.func @transform_5(%arg0: i32, %arg1: i32) -> (i32, i32, i32) {
    %c0_i32 = arith.constant 0 : i32
    %c0_i32_0 = arith.constant 0 : i32
    return %arg0, %arg1, %c0_i32 : i32, i32, i32
  }
}

</mosaic_0001>

<bundles_post_ra>
// kernel: tpu_custom_call.1
= control target key start
LH: loop header
LB: loop body
LE: loop exit
PB: predicated region body
PF: predicated region fallthrough
CT: control target
= control target key end

     0   :  { %11 = vsyncpa [#allocation3], 0  ;;  %s1501_s0 = inlined_call_operand.hbm [shape: f32[2,8,32], index: 0, kind: input, shape index: {}]   ;;  %s1502_s1 = inlined_call_operand.hbm [shape: f32[32,1536], index: 1, kind: input, shape index: {}]   ;;  %s1503_s2 = inlined_call_operand.hbm [shape: f32[1,1536], index: 2, kind: input, shape index: {}]   ;;  %s1504_s3 = inlined_call_operand.hbm [shape: f32[2,8,512], index: 3, kind: output, shape index: {0}]   ;;  %s1505_s4 = inlined_call_operand.hbm [shape: f32[2,8,512], index: 4, kind: output, shape index: {1}]   ;;  %s1506_s5 = inlined_call_operand.hbm [shape: f32[2,8,512], index: 5, kind: output, shape index: {2}]  }
   0x1   :  { %13 = vsyncpa [#allocation3 + $0x1], 0 }
   0x2   :  { %14 = vsyncpa [#allocation6], 0 }
   0x3   :  { %15 = vsyncpa [#allocation4], 0 }
   0x4   :  { %17 = vsyncpa [#allocation4 + $0x1], 0 }
   0x5   :  { %18 = vsyncpa [#allocation10], 0 }
   0x6   :  { %20 = vsyncpa [#allocation10 + $0x1], 0  ;;  %s1286_s18 = smov 0   ;;  %s1288_s19 = smov 0  }
   0x7   :  { %s1290_s20 = smov 0   ;;  %s1292_s21 = smov 0  }
   0x8   :  { %s1294_s22 = smov 0   ;;  %s1296_s23 = smov 0  }
   0x9 LB: > { %s1317_s24 = sadd.s32 4294967295, %s1250_s23   ;;  %p880_p0 = scmp.ge.s32.totalorder %s1250_s23, 1  ;;  %s1250_s23 = sphi %s1296_s23, %s26_s23   ;;  %s1246_s22 = sphi %s1294_s22, %s1517_s22   ;;  %s1242_s21 = sphi %s1292_s21, %s1516_s21   ;;  %s1238_s20 = sphi %s1290_s20, %s1515_s20   ;;  %s1234_s19 = sphi %s1288_s19, %s1514_s19   ;;  %s1230_s18 = sphi %s1286_s18, %s1513_s18  }
   0xa   : > { %p61_p1 = scmp.eq.s32.totalorder %s1317_s24, 0  ;;  %p197_p2 = scmp.lt.s32.totalorder %s1250_s23, 3 }
   0xb   : > { %s208_s27 = sshll.u32 %s1502_s1, 4  ;;  %s1252_s29 = smov [#allocation5]   ;;  %s209_s27 = int_to_ptr.hbm [resolvable:$true] %s208_s27 }
   0xc   : > { %p1325_p3 = pnand %p880_p0, %p197_p2  ;;  %s210_s30 = sshll.u32 %s1252_s29, 4  ;;  %s211_s30 = int_to_ptr.vmem [resolvable:$true] %s210_s30 }
   0xd   : > { %p883_p6 = scmp.ge.s32.totalorder %s1250_s23, 2  ;;  %s223_s8 = sshll.u32 %s1503_s2, 4  ;;  %s224_s8 = int_to_ptr.hbm [resolvable:$true] %s223_s8 }
   0xe   : > { %p935_p4 = pneg %p1325_p3  ;;  %s1253_s9 = smov 1536  }
   0xf   : > { %s1254_s10 = smov 96   ;;  %s1255_s11 = smov [#allocation7]  }
  0x10   : > { %p936_p5 = pnand %p935_p4, %p61_p1  ;;  %s225_s12 = sshll.u32 %s1255_s11, 4  ;;  %s226_s12 = int_to_ptr.vmem [resolvable:$true] %s225_s12 }
  0x11   : > { %s38_s13 = sadd.s32 1, %s1246_s22  ;;  %s1507_s14 = sadd.s32 4294967294, %s1250_s23  }
  0x12   : > { %938 = dma.hbm_to_vmem [thread:$0]  (!%p936_p5), %s209_s27, 6144, %s211_s30, [#allocation6], %s1253_s9, %s1253_s9, %s1254_s10  }
  0x13   : > { %941 = dma.hbm_to_vmem [thread:$0]  (!%p936_p5), %s224_s8, 192, %s226_s12, [#allocation6]  }
  0x14   : > { %p40_p7 = scmp.ge.s32.totalorder %s38_s13, 2  ;;  %s47_s15 = sadd.s32 1, %s1238_s20 }
  0x15   : > { %p54_p8 = scmp.ne.s32.totalorder %s1238_s20, %s1234_s19  ;;  %p55_p9 = scmp.eq.s32.totalorder %s1250_s23, 0 }
  0x16   : > { %s1519_s13 = smov (%p40_p7, %s38_s13), 0  ;;  %p60_p10 = scmp.ne.s32.totalorder %s1234_s19, %s1230_s18 }
  0x17   : > { %s42_s16 = ssub.s32 %s1246_s22, %s1519_s13  ;;  %p128_p11 = scmp.eq.s32.totalorder %s1317_s24, 1 }
  0x18   : > { %p45_p12 = scmp.eq.s32.totalorder %s42_s16, 0  ;;  %p1352_p13 = por %p61_p1, %p60_p10 }
  0x19   : > { %p1356_p0 = por %p128_p11, %p54_p8  ;;  %p134_p2 = scmp.eq.s32.totalorder %s1507_s14, 1 }
  0x1a   : > { %s1363_s26 = scalar_select %p45_p12, %s1238_s20, %s47_s15  }
  0x1b   : > { %p56_p4 = por %p55_p9, %p54_p8  ;;  %p1365_p5 = por %p134_p2, %p60_p10 }
  0x1c   : > { %s236_s29 = sand.u32 1, %s1238_s20   ;;  %s885_s30 = sshll.u32 %s1246_s22, 3 }
  0x1d   : > { %p958_p7 = scmp.lt.s32.totalorder %s1250_s23, 2  ;;  %s884_s6 = sshll.u32 %s236_s29, 3 }
  0x1e   : > { %s245_s9 = scalar_lea.hbm %s1501_s0, %s885_s30  ;;  %s240_s11 = scalar_lea.vmem [#allocation2], %s884_s6 }
  0x1f   : > { %s247_s10 = sshll.u32 %s245_s9, 4  ;;  %s249_s12 = sshll.u32 %s240_s11, 4  ;;  %s248_s10 = int_to_ptr.hbm [resolvable:$true] %s247_s10  ;;  %s250_s12 = int_to_ptr.vmem [resolvable:$true] %s249_s12 }
  0x20   : > { %p943_p11 = pnand %p958_p7, %p56_p4  ;;  %s237_s15 = scalar_lea.sflag [#allocation3], %s236_s29 }
  0x21   : > { %258 = sbr.rel (%p1325_p3) target bundleno = 216 (0xd8), region = 32  ;;  %s1378_s16 = sand.u32 (!%p1325_p3), 1, %s1234_s19  }
  0x22   : > { %945 = dma.hbm_to_vmem [thread:$0]  (!%p943_p11), %s248_s10, 128, %s250_s12, %s237_s15  }
  0x23   : > { %s887_s14 = sshll.u32 (!%p1325_p3), %s1378_s16, 3  ;;  %s261_s7 = scalar_lea.sflag (!%p1325_p3), [#allocation3], %s1378_s16 }
  0x24   : > { %s264_s30 = scalar_lea.vmem (!%p1325_p3), [#allocation2], %s887_s14 }
  0x26   : > { %1213 = dma.done.wait (%p1352_p13), %s261_s7, 128  }
  0x27   : > { %1215 = vsyncadd (%p1352_p13), %s261_s7, 4294967168 }
  0x28   : > { %1217 = dma.done.wait (%p61_p1), [#allocation6], 6336  }
  0x29   : > { %1219 = vsyncadd (%p61_p1), [#allocation6], 4294960960  ;;  %v351_v0 = vld [vmem:[#allocation5 + $0x130] sm:$0xff]  ;;  %v352_v1 = vld [vmem:[#allocation5 + $0x138] sm:$0xff]  ;;  %vm389_vm0 = vcmask 261120   ;;  %s1417_s28 = sshll.u32 %s1242_s21, 5 }
  0x2a   : > { %v339_v2 = vld [vmem:[#allocation5 + $0xd0] sm:$0xff]  ;;  %445 = vmatpush.msra.mxu2 %v351_v0  ;;  %465 = vmatpush.msra.mxu3 %v352_v1  ;;  %v340_v3 = vld [vmem:[#allocation5 + $0xd8] sm:$0xff]  ;;  %v349_v6 = vld [vmem:[#allocation5 + $0x120] sm:$0xff]  ;;  %s1420_s14 = sshll.u32 %s1378_s16, 5  ;;  %s669_s6 = scalar_lea.hbm %s1504_s3, %s1417_s28 }
  0x2b   : > { %v327_v4 = vld [vmem:[#allocation5 + $0x70] sm:$0xff]  ;;  %v328_v5 = vld [vmem:[#allocation5 + $0x78] sm:$0xff]  ;;  %v350_v7 = vld [vmem:[#allocation5 + $0x128] sm:$0xff]  ;;  %405 = vmatpush.msra.mxu0 %v349_v6  ;;  %s297_s21 = scalar_lea.vmem [#allocation8], %s1420_s14  ;;  %s673_s9 = sshll.u32 %s669_s6, 4  ;;  %s674_s9 = int_to_ptr.hbm [resolvable:$true] %s673_s9 }
  0x2c   : > { %446 = vmatpush.msra.mxu2 %v339_v2  ;;  %466 = vmatpush.msra.mxu3 %v340_v3  ;;  %v315_v8 = vld [vmem:[#allocation5 + $0x10] sm:$0xff]  ;;  %v316_v9 = vld [vmem:[#allocation5 + $0x18] sm:$0xff]  ;;  %v337_v10 = vld [vmem:[#allocation5 + $0xc0] sm:$0xff]  ;;  %s671_s8 = sshll.u32 %s297_s21, 4  ;;  %s646_s10 = scalar_lea.sflag [#allocation4], %s1378_s16  ;;  %s672_s8 = int_to_ptr.vmem [resolvable:$true] %s671_s8 }
  0x2d   : > { %425 = vmatpush.msra.mxu1 %v350_v7  ;;  %v338_v11 = vld [vmem:[#allocation5 + $0xc8] sm:$0xff]  ;;  %v1390_v12 = vld [vmem:[%s264_s30] sm:$0xff]  ;;  %406 = vmatpush.msra.mxu0 %v337_v10  ;;  %v325_v15 = vld [vmem:[#allocation5 + $0x60] sm:$0xff]  ;;  %s1118_s11 = sshra.s32 %s674_s9, 4  ;;  %s1124_s30 = scalar_lea.hbm %s1504_s3, 64  ;;  %s1119_s11 = int_to_ptr.hbm [resolvable:$true] %s1118_s11 }
  0x2e   : > { %447 = vmatpush.msra.mxu2 %v327_v4  ;;  %467 = vmatpush.msra.mxu3 %v328_v5  ;;  %v355_v13 = vld [vmem:[#allocation5 + $0x150] sm:$0xff]  ;;  %v356_v14 = vld [vmem:[#allocation5 + $0x158] sm:$0xff]  ;;  %v326_v16 = vld [vmem:[#allocation5 + $0x68] sm:$0xff]  ;;  %s1120_s12 = scalar_lea.hbm %s1119_s11, 32  ;;  %p1125_p9 = scmp.lt.s32.totalorder %s1119_s11, %s1504_s3 }
  0x2f   : > { %426 = vmatpush.msra.mxu1 %v338_v11  ;;  %v343_v17 = vld [vmem:[#allocation5 + $0xf0] sm:$0xff]  ;;  %v344_v18 = vld [vmem:[#allocation5 + $0xf8] sm:$0xff]  ;;  %v313_v19 = vld [vmem:[#allocation5] sm:$0xff]  ;;  %407 = vmatpush.msra.mxu0 %v325_v15  ;;  %p1121_p1 = scmp.ne.s32.totalorder %s1119_s11, %s1120_s12  ;;  %p1126_p10 = scmp.lt.s32.totalorder %s1124_s30, %s1120_s12 }
  0x30   : > { %448 = vmatpush.msra.mxu2 %v315_v8  ;;  %468 = vmatpush.msra.mxu3 %v316_v9  ;;  %v314_v20 = vld [vmem:[#allocation5 + $0x8] sm:$0xff]  ;;  %v331_v21 = vld [vmem:[#allocation5 + $0x90] sm:$0xff]  ;;  %v332_v22 = vld [vmem:[#allocation5 + $0x98] sm:$0xff] }
  0x31   : > { %895 = vmatmul.msk.f32.vlgmr.msra.gmra.mxu2 %vm389_vm0, %v1390_v12  ;;  %896 = vmatmul.msk.f32.vlgmr.msra.gmra.mxu3 %vm389_vm0, %v1390_v12  ;;  %v353_v23 = vld [vmem:[#allocation5 + $0x140] sm:$0xff]  ;;  %v354_v24 = vld [vmem:[#allocation5 + $0x148] sm:$0xff]  ;;  %v319_v25 = vld [vmem:[#allocation5 + $0x30] sm:$0xff]  ;;  %p1122_p3 = pnand %p1121_p1, %p1356_p0  ;;  %p1127_p12 = por %p1126_p10, %p1125_p9 }
  0x32   : > { %525 = vmatpush.msrb.mxu2 %v355_v13  ;;  %545 = vmatpush.msrb.mxu3 %v356_v14  ;;  %v320_v26 = vld [vmem:[#allocation5 + $0x38] sm:$0xff]  ;;  %v341_v27 = vld [vmem:[#allocation5 + $0xe0] sm:$0xff]  ;;  %v342_v28 = vld [vmem:[#allocation5 + $0xe8] sm:$0xff] }
  0x33   : > { %427 = vmatpush.msra.mxu1 %v326_v16  ;;  %408 = vmatpush.msra.mxu0 %v313_v19  ;;  %v359_v29 = vld [vmem:[#allocation5 + $0x170] sm:$0xff]  ;;  %v360_v30 = vld [vmem:[#allocation5 + $0x178] sm:$0xff]  ;;  %v329_v31 = vld [vmem:[#allocation5 + $0x80] sm:$0xff]  ;;  %p1123_p8 = pneg %p1122_p3 }
  0x34   : > { %526 = vmatpush.msrb.mxu2 %v343_v17  ;;  %546 = vmatpush.msrb.mxu3 %v344_v18  ;;  %v330_v32 = vld [vmem:[#allocation5 + $0x88] sm:$0xff]  ;;  %v347_v33 = vld [vmem:[#allocation5 + $0x110] sm:$0xff]  ;;  %v348_v34 = vld [vmem:[#allocation5 + $0x118] sm:$0xff] }
  0x35   : > { %428 = vmatpush.msra.mxu1 %v314_v20  ;;  %893 = vmatmul.msk.f32.vlgmr.msra.gmra.mxu0 %vm389_vm0, %v1390_v12  ;;  %v317_v35 = vld [vmem:[#allocation5 + $0x20] sm:$0xff]  ;;  %v318_v36 = vld [vmem:[#allocation5 + $0x28] sm:$0xff]  ;;  %v335_v37 = vld [vmem:[#allocation5 + $0xb0] sm:$0xff]  ;;  %p1128_p13 = pnand %p1127_p12, %p1123_p8 }
  0x36   : > { %527 = vmatpush.msrb.mxu2 %v331_v21  ;;  %547 = vmatpush.msrb.mxu3 %v332_v22  ;;  %v336_v38 = vld [vmem:[#allocation5 + $0xb8] sm:$0xff]  ;;  %v357_v39 = vld [vmem:[#allocation5 + $0x160] sm:$0xff]  ;;  %v358_v40 = vld [vmem:[#allocation5 + $0x168] sm:$0xff] }
  0x37   : > { %894 = vmatmul.msk.f32.vlgmr.msra.gmra.mxu1 %vm389_vm0, %v1390_v12  ;;  %485 = vmatpush.msrb.mxu0 %v353_v23  ;;  %v323_v41 = vld [vmem:[#allocation5 + $0x50] sm:$0xff]  ;;  %v324_v42 = vld [vmem:[#allocation5 + $0x58] sm:$0xff]  ;;  %v345_v43 = vld [vmem:[#allocation5 + $0x100] sm:$0xff] }
  0x38   : > { %505 = vmatpush.msrb.mxu1 %v354_v24  ;;  %528 = vmatpush.msrb.mxu2 %v319_v25  ;;  %v346_v44 = vld [vmem:[#allocation5 + $0x108] sm:$0xff]  ;;  %v333_v45 = vld [vmem:[#allocation5 + $0xa0] sm:$0xff] }
  0x39   : > { %548 = vmatpush.msrb.mxu3 %v320_v26  ;;  %486 = vmatpush.msrb.mxu0 %v341_v27  ;;  %v334_v46 = vld [vmem:[#allocation5 + $0xa8] sm:$0xff]  ;;  %v321_v47 = vld [vmem:[#allocation5 + $0x40] sm:$0xff] }
  0x3a   : > { %506 = vmatpush.msrb.mxu1 %v342_v28  ;;  %899 = vmatmul.msk.f32.vlgmr.msrb.gmra.mxu2 %vm389_vm0, %v1390_v12  ;;  %v322_v48 = vld [vmem:[#allocation5 + $0x48] sm:$0xff]  ;;  %v361_v49 = vld [vmem:[#allocation7] sm:$0xff] }
  0x3b   : > { %900 = vmatmul.msk.f32.vlgmr.msrb.gmra.mxu3 %vm389_vm0, %v1390_v12  ;;  %605 = vmatpush.msra.mxu2 %v359_v29  ;;  %v365_v50 = vperm.slane %v361_v49, 0  ;;  %v366_v51 = vperm.slane %v361_v49, 1  ;;  %v367_v52 = vperm.slane %v361_v49, 2  ;;  %v368_v53 = vperm.slane %v361_v49, 3 }
  0x3c   : > { %625 = vmatpush.msra.mxu3 %v360_v30  ;;  %487 = vmatpush.msrb.mxu0 %v329_v31  ;;  %v369_v62 = vperm.slane %v361_v49, 4  ;;  %v370_v63 = vperm.slane %v361_v49, 5 }
  0x3d   : > { %507 = vmatpush.msrb.mxu1 %v330_v32  ;;  %606 = vmatpush.msra.mxu2 %v347_v33 }
  0x3e   : > { %626 = vmatpush.msra.mxu3 %v348_v34  ;;  %488 = vmatpush.msrb.mxu0 %v317_v35 }
  0x3f   : > { %508 = vmatpush.msrb.mxu1 %v318_v36  ;;  %607 = vmatpush.msra.mxu2 %v335_v37 }
  0x40   : > { %627 = vmatpush.msra.mxu3 %v336_v38  ;;  %897 = vmatmul.msk.f32.vlgmr.msrb.gmra.mxu0 %vm389_vm0, %v1390_v12 }
  0x41   : > { %898 = vmatmul.msk.f32.vlgmr.msrb.gmra.mxu1 %vm389_vm0, %v1390_v12  ;;  %565 = vmatpush.msra.mxu0 %v357_v39 }
  0x42   : > { %585 = vmatpush.msra.mxu1 %v358_v40  ;;  %608 = vmatpush.msra.mxu2 %v323_v41 }
  0x43   : > { %628 = vmatpush.msra.mxu3 %v324_v42  ;;  %566 = vmatpush.msra.mxu0 %v345_v43 }
  0x44   : > { %586 = vmatpush.msra.mxu1 %v346_v44  ;;  %903 = vmatmul.msk.f32.vlgmr.msra.gmra.mxu2 %vm389_vm0, %v1390_v12 }
  0x45   : > { %904 = vmatmul.msk.f32.vlgmr.msra.gmra.mxu3 %vm389_vm0, %v1390_v12  ;;  %567 = vmatpush.msra.mxu0 %v333_v45 }
  0x46   : > { %587 = vmatpush.msra.mxu1 %v334_v46 }
  0x47   : > { %568 = vmatpush.msra.mxu0 %v321_v47 }
  0x48   : > { %588 = vmatpush.msra.mxu1 %v322_v48  ;;  %901 = vmatmul.msk.f32.vlgmr.msra.gmra.mxu0 %vm389_vm0, %v1390_v12 }
  0x49   : > { %902 = vmatmul.msk.f32.vlgmr.msra.gmra.mxu1 %vm389_vm0, %v1390_v12 }
  0xb2   : > { %v410_v54 = vpop.f32.mrf.mxu0 }
  0xb3   : > { %v411_v56 = vadd.f32 %v410_v54, %v365_v50 }
  0xb4   : > { %v430_v55 = vpop.f32.mrf.mxu1  ;;  %v450_v58 = vpop.f32.mrf.mxu2 }
  0xb5   : > { %v431_v57 = vadd.f32 %v430_v55, %v366_v51  ;;  %v470_v59 = vpop.f32.mrf.mxu3  ;;  %v451_v60 = vadd.f32 %v450_v58, %v367_v52  ;;  %633 = vst [vmem:[%s297_s21] sm:$0xff] %v411_v56 }
  0xb6   : > { %v471_v61 = vadd.f32 %v470_v59, %v368_v53 }
  0xb7   : > { %634 = vst [vmem:[%s297_s21 + $0x8] sm:$0xff] %v431_v57 }
  0xb8   : > { %635 = vst [vmem:[%s297_s21 + $0x10] sm:$0xff] %v451_v60 }
  0xb9   : > { %636 = vst [vmem:[%s297_s21 + $0x18] sm:$0xff] %v471_v61 }
  0xba   : > { %1131 = shalt.err (!%p1128_p13)
}
  0xbb   : > { %929 = dma.vmem_to_hbm [thread:$0]  (%p1356_p0), %s672_s8, 512, %s674_s9, %s646_s10   ;;  %v371_v0 = vperm.slane %v361_v49, 6  ;;  %v372_v1 = vperm.slane %v361_v49, 7  ;;  %v362_v10 = vld [vmem:[#allocation7 + $0x8] sm:$0xf] }
  0xbc   : > { %s686_s21 = scalar_lea.hbm %s1505_s4, %s1417_s28  ;;  %s650_s15 = sand.u32 1, %s1317_s24   ;;  %v373_v11 = vperm.slane %v362_v10, 0  ;;  %v374_v12 = vperm.slane %v362_v10, 1  ;;  %v375_v13 = vperm.slane %v362_v10, 2  ;;  %v376_v14 = vperm.slane %v362_v10, 3 }
  0xbd   : > { %v490_v2 = vpop.f32.mrf.mxu0  ;;  %v530_v6 = vpop.f32.mrf.mxu2  ;;  %s304_s11 = scalar_lea.vmem [#allocation9], %s1420_s14  ;;  %s1444_s7 = sshll.u32 %s686_s21, 4  ;;  %s691_s7 = int_to_ptr.hbm [resolvable:$true] %s1444_s7 }
  0xbe   : > { %v510_v3 = vpop.f32.mrf.mxu1  ;;  %v491_v4 = vadd.f32 %v490_v2, %v369_v62  ;;  %v550_v7 = vpop.f32.mrf.mxu3  ;;  %s688_s12 = sshll.u32 %s304_s11, 4  ;;  %v531_v8 = vadd.f32 %v530_v6, %v371_v0  ;;  %s703_s9 = scalar_lea.hbm %s1506_s5, %s1417_s28  ;;  %s689_s12 = int_to_ptr.vmem [resolvable:$true] %s688_s12 }
  0xbf   : > { %v511_v5 = vadd.f32 %v510_v3, %v370_v63  ;;  %v551_v9 = vadd.f32 %v550_v7, %v372_v1  ;;  %s1451_s10 = scalar_lea.sflag [#allocation10], %s650_s15  ;;  %s1146_s30 = sshra.s32 %s691_s7, 4  ;;  %s1147_s30 = int_to_ptr.hbm [resolvable:$true] %s1146_s30 }
  0xc0   : > { %637 = vst [vmem:[%s304_s11] sm:$0xff] %v491_v4  ;;  %s1148_s17 = scalar_lea.hbm %s1147_s30, 32  ;;  %s1152_s6 = scalar_lea.hbm %s1505_s4, 64 }
  0xc1   : > { %638 = vst [vmem:[%s304_s11 + $0x8] sm:$0xff] %v511_v5  ;;  %p1149_p2 = scmp.ne.s32.totalorder %s1147_s30, %s1148_s17  ;;  %p1153_p11 = scmp.lt.s32.totalorder %s1147_s30, %s1505_s4 }
  0xc2   : > { %639 = vst [vmem:[%s304_s11 + $0x10] sm:$0xff] %v531_v8  ;;  %p1154_p1 = scmp.lt.s32.totalorder %s1152_s6, %s1148_s17 }
  0xc3   : > { %640 = vst [vmem:[%s304_s11 + $0x18] sm:$0xff] %v551_v9  ;;  %p1150_p4 = pnand %p1149_p2, %p1356_p0 }
  0xc4   : > { %p1155_p3 = por %p1154_p1, %p1153_p11 }
  0xc5   : > { %p1151_p7 = pneg %p1150_p4 }
  0xc7   : > { %p1156_p8 = pnand %p1155_p3, %p1151_p7 }
  0xc9   : > { %1159 = shalt.err (!%p1156_p8)
}
  0xca   : > { %930 = dma.vmem_to_hbm [thread:$0]  (%p1356_p0), %s689_s12, 512, %s691_s7, %s1451_s10   ;;  %v570_v15 = vpop.f32.mrf.mxu0  ;;  %v590_v16 = vpop.f32.mrf.mxu1 }
  0xcb   : > { %v571_v17 = vadd.f32 %v570_v15, %v373_v11  ;;  %s311_s28 = scalar_lea.vmem [#allocation11], %s1420_s14  ;;  %v591_v18 = vadd.f32 %v590_v16, %v374_v12  ;;  %s707_s24 = sshll.u32 %s703_s9, 4  ;;  %v610_v19 = vpop.f32.mrf.mxu2  ;;  %v630_v20 = vpop.f32.mrf.mxu3  ;;  %s708_s24 = int_to_ptr.hbm [resolvable:$true] %s707_s24 }
  0xcc   : > { %s705_s15 = sshll.u32 %s311_s28, 4  ;;  %v611_v21 = vadd.f32 %v610_v19, %v375_v13  ;;  %v631_v22 = vadd.f32 %v630_v20, %v376_v14  ;;  %s1174_s8 = sshra.s32 %s708_s24, 4  ;;  %s706_s15 = int_to_ptr.vmem [resolvable:$true] %s705_s15  ;;  %s1175_s8 = int_to_ptr.hbm [resolvable:$true] %s1174_s8 }
  0xcd   : > { %641 = vst [vmem:[%s311_s28] sm:$0xff] %v571_v17  ;;  %s1176_s12 = scalar_lea.hbm %s1175_s8, 32  ;;  %s1180_s9 = scalar_lea.hbm %s1506_s5, 64 }
  0xce   : > { %642 = vst [vmem:[%s311_s28 + $0x8] sm:$0xff] %v591_v18  ;;  %p1177_p9 = scmp.ne.s32.totalorder %s1175_s8, %s1176_s12  ;;  %p1181_p13 = scmp.lt.s32.totalorder %s1175_s8, %s1506_s5 }
  0xcf   : > { %643 = vst [vmem:[%s311_s28 + $0x10] sm:$0xff] %v611_v21  ;;  %p1182_p2 = scmp.lt.s32.totalorder %s1180_s9, %s1176_s12 }
  0xd0   : > { %644 = vst [vmem:[%s311_s28 + $0x18] sm:$0xff] %v631_v22  ;;  %p1178_p10 = pnand %p1177_p9, %p1356_p0 }
  0xd1   : > { %p1183_p4 = por %p1182_p2, %p1181_p13 }
  0xd2   : > { %p1179_p12 = pneg %p1178_p10 }
  0xd4   : > { %p1184_p7 = pnand %p1183_p4, %p1179_p12 }
  0xd6   : > { %1187 = shalt.err (!%p1184_p7)
}
  0xd7   : > { %931 = dma.vmem_to_hbm [thread:$0]  (%p1356_p0), %s706_s15, 512, %s708_s24, %s1451_s10  }
  0xd8 PF: > { %s719_s29 = sand.u32 1, %s1230_s18   ;;  %p947_p11 = pnand %p883_p6, %p1365_p5 }
  0xd9   : > { %s720_s16 = scalar_lea.sflag [#allocation4], %s719_s29 }
  0xda   : > { %p948_p1 = pneg %p947_p11 }
  0xdc   : > { %1221 = dma.done.wait (%p948_p1), %s720_s16, 512  }
  0xdd   : > { %1223 = vsyncadd (%p948_p1), %s720_s16, 4294966784  ;;  %s1512_s6 = sadd.s32 4294967294, %s1250_s23  }
  0xde   : > { %s729_s21 = sand.u32 1, %s1512_s6  }
  0xdf   : > { %s730_s11 = scalar_lea.sflag [#allocation10], %s729_s21 }
  0xe0   : > { %1225 = dma.done.wait (%p948_p1), %s730_s11, 1024  }
  0xe1   : > { %1227 = vsyncadd (%p948_p1), %s730_s11, 4294966272  ;;  %s26_s23 = sadd.s32 1, %s1250_s23   ;;  %s1513_s18 = smov %s1234_s19 }
  0xe2   : > { %p23_p0 = scmp.ge.s32.totalorder %s26_s23, 4   ;;  %s1514_s19 = smov %s1238_s20 }
  0xe3   : > { %s1515_s20 = smov %s1363_s26  ;;  %s1516_s21 = smov %s1246_s22 }
  0xe4   : > { %s1517_s22 = smov %s1519_s13  ;;  %25 = sbr.rel (!%p23_p0) target bundleno = 9 (0x9), region = 117 }
  0xe9   :  { %746 = vsyncpa [#allocation3], 1 }
  0xea   :  { %748 = vsyncpa [#allocation3 + $0x1], 1 }
  0xeb   :  { %749 = vsyncpa [#allocation6], 1 }
  0xec   :  { %750 = vsyncpa [#allocation4], 1 }
  0xed   :  { %752 = vsyncpa [#allocation4 + $0x1], 1 }
  0xee   :  { %753 = vsyncpa [#allocation10], 1 }
  0xef   :  { %755 = vsyncpa [#allocation10 + $0x1], 1 }

</bundles_post_ra>
